<compile_context>
chip_gen: v7x
topology: tpu7x:2x2x1
jax: 0.10.0
libtpu: 0.0.40
codegen_flags: <defaults>
</compile_context>

<pallas_src>
import functools

import jax
import jax.numpy as jnp
from jax.experimental import pallas as pl
from jax.experimental.pallas import tpu as pltpu


def _round_up(x: int, m: int) -> int:
    return ((x + m - 1) // m) * m


def _linear_kernel(x_ref, w_ref, b_ref, o_ref, acc_ref):
    # x_ref: (tm, tk)   w_ref: (tk, tn)   b_ref: (1, tn)
    # o_ref: (tm, tn)   acc_ref: (tm, tn) f32 scratch
    k = pl.program_id(2)

    @pl.when(k == 0)
    def _init():
        acc_ref[...] = jnp.zeros_like(acc_ref)

    acc_ref[...] += jnp.dot(
        x_ref[...], w_ref[...], preferred_element_type=jnp.float32
    )

    @pl.when(k == pl.num_programs(2) - 1)
    def _finalize():
        # Bias add + cast once per (i, j) output tile, not per K step.
        acc = acc_ref[...] + b_ref[...].astype(jnp.float32)
        o_ref[...] = acc.astype(o_ref.dtype)


@functools.partial(jax.jit, static_argnames=("tm", "tn", "tk"))
def meta_linear(x, weight, bias, *, tm=256, tn=256, tk=512):
    """f.linear(x, weight, bias) with a tiled Pallas TPU kernel."""
    out_features, in_features = weight.shape
    assert x.shape[-1] == in_features
    assert bias.shape == (out_features,)

    lead_shape = x.shape[:-1]
    x2d = x.reshape(-1, in_features)
    m, k, n = x2d.shape[0], in_features, out_features

    # --- choose tile sizes clamped to the (padded) problem size -------------
    # Sublane granularity for the M axis, lane granularity (128) for K and N.
    sublane = 8 if x.dtype == jnp.float32 else 16
    tm_eff = min(tm, _round_up(m, sublane))
    tn_eff = min(tn, _round_up(n, 128))
    tk_eff = min(tk, _round_up(k, 128))

    m_pad = _round_up(m, tm_eff)
    n_pad = _round_up(n, tn_eff)
    k_pad = _round_up(k, tk_eff)

    # --- pad operands so every block is a full tile --------------------------
    # Zero-padded rows/cols contribute nothing to the contraction; padded
    # output columns are sliced off below.
    if (m_pad, k_pad) != (m, k):
        x2d = jnp.pad(x2d, ((0, m_pad - m), (0, k_pad - k)))
    # Present W as [K, N]: N lane-dense for MXU feed and output stores.
    w_kn = weight.T
    if (k_pad, n_pad) != (k, n):
        w_kn = jnp.pad(w_kn, ((0, k_pad - k), (0, n_pad - n)))
    b2d = bias.reshape(1, n)
    if n_pad != n:
        b2d = jnp.pad(b2d, ((0, 0), (0, n_pad - n)))

    grid = (m_pad // tm_eff, n_pad // tn_eff, k_pad // tk_eff)

    # --- VMEM budget: 2x double-buffered inputs/outputs + f32 accumulator ----
    in_bytes = jnp.dtype(x.dtype).itemsize
    out_bytes = jnp.dtype(x.dtype).itemsize
    per_step = (
        2 * (tm_eff * tk_eff + tk_eff * tn_eff + tn_eff) * in_bytes
        + 2 * tm_eff * tn_eff * out_bytes
        + tm_eff * tn_eff * 4
    )
    # ~2x headroom, floor 16 MiB, cap at 48 MiB (safe under v7x's 64 MiB).
    vmem_limit = min(max(2 * per_step, 16 * 1024 * 1024), 48 * 1024 * 1024)

    cost = pl.CostEstimate(
        flops=2 * m * n * k,
        transcendentals=0,
        bytes_accessed=(m * k + k * n + n) * in_bytes + m * n * out_bytes,
    )

    out = pl.pallas_call(
        _linear_kernel,
        out_shape=jax.ShapeDtypeStruct((m_pad, n_pad), x.dtype),
        grid_spec=pltpu.PrefetchScalarGridSpec(
            num_scalar_prefetch=0,
            grid=grid,
            in_specs=[
                pl.BlockSpec((tm_eff, tk_eff), lambda i, j, kk: (i, kk)),
                pl.BlockSpec((tk_eff, tn_eff), lambda i, j, kk: (kk, j)),
                pl.BlockSpec((1, tn_eff), lambda i, j, kk: (0, j)),
            ],
            out_specs=pl.BlockSpec((tm_eff, tn_eff), lambda i, j, kk: (i, j)),
            scratch_shapes=[pltpu.VMEM((tm_eff, tn_eff), jnp.float32)],
        ),
        compiler_params=pltpu.CompilerParams(
            dimension_semantics=("parallel", "parallel", "arbitrary"),
            vmem_limit_bytes=int(vmem_limit),
        ),
        cost_estimate=cost,
    )(x2d, w_kn, b2d)

    out = out[:m, :n]
    return out.reshape(*lead_shape, out_features)


if __name__ == "__main__":
    key = jax.random.PRNGKey(0)
    k_x, k_w, k_b = jax.random.split(key, 3)

    # Small shapes consistent with a linear layer: [batch, seq, in_features].
    batch, seq, in_features, out_features = 4, 8, 32, 64

    # Deterministic synthetic "init_layer" parameters (no checkpoint load).
    x = jax.random.normal(k_x, (batch, seq, in_features), dtype=jnp.float32)
    weight = (
        jax.random.normal(k_w, (out_features, in_features), dtype=jnp.float32)
        * 0.1
    )
    bias = jax.random.normal(k_b, (out_features,), dtype=jnp.float32) * 0.1

    # NOTE: keeping f32 weights to match PyTorch f.linear numerics exactly;
    # for production, cast weight (and x) to bf16 in the wrapper to halve HBM
    # traffic while the kernel still accumulates in f32.
    y = meta_linear(x, weight, bias)
    jax.block_until_ready(y)

    # Reference check against plain JAX (same semantics as torch f.linear).
    y_ref = x @ weight.T + bias
    assert y.shape == (batch, seq, out_features)
    assert jnp.allclose(y, y_ref, atol=1e-3, rtol=1e-3)

    print("KERNEL_OK")
</pallas_src>

<mosaic_0001>
module attributes {stable_mosaic.version = 11 : i64} {
  func.func @_linear_kernel(%arg0: i32, %arg1: i32, %arg2: i32, %arg3: memref<32x128xf32, #tpu.memory_space<vmem>>, %arg4: memref<128x128xf32, #tpu.memory_space<vmem>>, %arg5: memref<1x128xf32, #tpu.memory_space<vmem>>, %arg6: memref<32x128xf32, #tpu.memory_space<vmem>>, %arg7: memref<32x128xf32, #tpu.memory_space<vmem>>) attributes {dimension_semantics = [#tpu.dimension_semantics<parallel>, #tpu.dimension_semantics<parallel>, #tpu.dimension_semantics<arbitrary>], iteration_bounds = array<i64: 1, 1, 1>, scalar_prefetch = 0 : i64, scratch_operands = 1 : i64, tpu.core_type = #tpu.core_type<tc>, window_params = [{transform_indices = @transform_0, window_bounds = array<i64: 32, 128>}, {transform_indices = @transform_1, window_bounds = array<i64: 128, 128>}, {transform_indices = @transform_2, window_bounds = array<i64: 1, 128>}, {transform_indices = @transform_3, window_bounds = array<i64: 32, 128>}]} {
    %c0_i32 = arith.constant 0 : i32
    %0 = arith.cmpi eq, %arg2, %c0_i32 : i32
    %1 = arith.extui %0 : i1 to i32
    %c0_i32_0 = arith.constant 0 : i32
    %2 = arith.cmpi ne, %1, %c0_i32_0 : i32
    scf.if %2 {
      %cst_10 = arith.constant 0.000000e+00 : f32
      %12 = vector.broadcast %cst_10 : f32 to vector<32x128xf32>
      %c0_11 = arith.constant 0 : index
      %c0_12 = arith.constant 0 : index
      %13 = vector.load %arg7[%c0_11, %c0_12] : memref<32x128xf32, #tpu.memory_space<vmem>>, vector<32x128xf32>
      tpu.vector_store %arg7[%c0_11, %c0_12], %12 {strides = array<i32>} : memref<32x128xf32, #tpu.memory_space<vmem>>, vector<32x128xf32>,
    } else {
    }
    %c0 = arith.constant 0 : index
    %c0_1 = arith.constant 0 : index
    %3 = vector.load %arg7[%c0, %c0_1] : memref<32x128xf32, #tpu.memory_space<vmem>>, vector<32x128xf32>
    %c0_2 = arith.constant 0 : index
    %c0_3 = arith.constant 0 : index
    %4 = vector.load %arg3[%c0_2, %c0_3] : memref<32x128xf32, #tpu.memory_space<vmem>>, vector<32x128xf32>
    %c0_4 = arith.constant 0 : index
    %c0_5 = arith.constant 0 : index
    %5 = vector.load %arg4[%c0_4, %c0_5] : memref<128x128xf32, #tpu.memory_space<vmem>>, vector<128x128xf32>
    %cst = arith.constant dense<0.000000e+00> : vector<32x128xf32>
    %6 = tpu.matmul %4, %5, %cst {dimension_numbers = #tpu.dot_dimension_numbers<[1], [0], [0], [1], [0, 0, 1, 1], [], []>} : vector<32x128xf32>, vector<128x128xf32>, vector<32x128xf32> -> vector<32x128xf32>
    %7 = arith.addf %3, %6 : vector<32x128xf32>
    %c0_6 = arith.constant 0 : index
    %c0_7 = arith.constant 0 : index
    %8 = vector.load %arg7[%c0_6, %c0_7] : memref<32x128xf32, #tpu.memory_space<vmem>>, vector<32x128xf32>
    tpu.vector_store %arg7[%c0_6, %c0_7], %7 {strides = array<i32>} : memref<32x128xf32, #tpu.memory_space<vmem>>, vector<32x128xf32>,
    %c0_i32_8 = arith.constant 0 : i32
    %9 = arith.cmpi eq, %arg2, %c0_i32_8 : i32
    %10 = arith.extui %9 : i1 to i32
    %c0_i32_9 = arith.constant 0 : i32
    %11 = arith.cmpi ne, %10, %c0_i32_9 : i32
    scf.if %11 {
      %c0_10 = arith.constant 0 : index
      %c0_11 = arith.constant 0 : index
      %12 = vector.load %arg7[%c0_10, %c0_11] : memref<32x128xf32, #tpu.memory_space<vmem>>, vector<32x128xf32>
      %c0_12 = arith.constant 0 : index
      %c0_13 = arith.constant 0 : index
      %13 = vector.load %arg5[%c0_12, %c0_13] : memref<1x128xf32, #tpu.memory_space<vmem>>, vector<1x128xf32>
      %14 = vector.broadcast %13 : vector<1x128xf32> to vector<32x128xf32>
      %15 = arith.addf %12, %14 : vector<32x128xf32>
      %c0_14 = arith.constant 0 : index
      %c0_15 = arith.constant 0 : index
      %16 = vector.load %arg6[%c0_14, %c0_15] : memref<32x128xf32, #tpu.memory_space<vmem>>, vector<32x128xf32>
      tpu.vector_store %arg6[%c0_14, %c0_15], %15 {strides = array<i32>} : memref<32x128xf32, #tpu.memory_space<vmem>>, vector<32x128xf32>,
    } else {
    }
    return
  }
  func.func @transform_0(%arg0: i32, %arg1: i32, %arg2: i32) -> (i32, i32) {
    %c0_i32 = arith.constant 0 : i32
    return %arg0, %arg2 : i32, i32
  }
  func.func @transform_1(%arg0: i32, %arg1: i32, %arg2: i32) -> (i32, i32) {
    %c0_i32 = arith.constant 0 : i32
    return %arg2, %arg1 : i32, i32
  }
  func.func @transform_2(%arg0: i32, %arg1: i32, %arg2: i32) -> (i32, i32) {
    %c0_i32 = arith.constant 0 : i32
    %c0_i32_0 = arith.constant 0 : i32
    return %c0_i32, %arg1 : i32, i32
  }
  func.func @transform_3(%arg0: i32, %arg1: i32, %arg2: i32) -> (i32, i32) {
    %c0_i32 = arith.constant 0 : i32
    return %arg0, %arg1 : i32, i32
  }
}

</mosaic_0001>

<bundles_post_ra>
// kernel: meta_linear.1
= control target key start
LH: loop header
LB: loop body
LE: loop exit
PB: predicated region body
PF: predicated region fallthrough
CT: control target
= control target key end

     0   :  { %s367_s1 = inlined_call_operand.vmem [shape: f32[128,128], index: 1, kind: input, shape index: {}]   ;;  %s368_s0 = inlined_call_operand.vmem [shape: f32[32,128], index: 0, kind: input, shape index: {}]   ;;  %s369_s2 = inlined_call_operand.vmem [shape: f32[1,128], index: 2, kind: input, shape index: {}]   ;;  %s370_s3 = inlined_call_operand.vmem [shape: f32[32,128], index: 3, kind: output, shape index: {}]  }
   0x1   :  { %v30_v0 = vld [vmem:[%s367_s1] sm:$0xff]  ;;  %v31_v1 = vld [vmem:[%s367_s1 + $0x8] sm:$0xff]  ;;  %v32_v2 = vld [vmem:[%s367_s1 + $0x10] sm:$0xff] }
   0x2   :  { %v224_v3 = vpack.c.bf16 %v31_v1, %v30_v0  ;;  %v33_v4 = vld [vmem:[%s367_s1 + $0x18] sm:$0xff]  ;;  %v34_v6 = vld [vmem:[%s367_s1 + $0x20] sm:$0xff]  ;;  %v35_v7 = vld [vmem:[%s367_s1 + $0x28] sm:$0xff] }
   0x3   :  { %v228_v5 = vpack.c.bf16 %v33_v4, %v32_v2  ;;  %v232_v8 = vpack.c.bf16 %v35_v7, %v34_v6  ;;  %v26_v9 = vld [vmem:[%s368_s0] sm:$0xff]  ;;  %v28_v10 = vld [vmem:[%s368_s0 + $0x10] sm:$0xff]  ;;  %v37_v12 = vld [vmem:[%s367_s1 + $0x38] sm:$0xff] }
   0x4   :  { %225 = vmatprep.subr.bf16.mxu0 %v224_v3  ;;  %256 = vmatprep.subr.bf16.mxu1 %v224_v3  ;;  %v36_v11 = vld [vmem:[%s367_s1 + $0x30] sm:$0xff]  ;;  %v38_v14 = vld [vmem:[%s367_s1 + $0x40] sm:$0xff]  ;;  %v39_v15 = vld [vmem:[%s367_s1 + $0x48] sm:$0xff] }
   0x5   :  { %227 = vmatpush3.bf16.msra.mxu0 %v224_v3  ;;  %264 = vmatpush3.bf16.msra.mxu1 %v224_v3  ;;  %v236_v13 = vpack.c.bf16 %v37_v12, %v36_v11  ;;  %v240_v16 = vpack.c.bf16 %v39_v15, %v38_v14  ;;  %v40_v17 = vld [vmem:[%s367_s1 + $0x50] sm:$0xff]  ;;  %v41_v18 = vld [vmem:[%s367_s1 + $0x58] sm:$0xff]  ;;  %v42_v20 = vld [vmem:[%s367_s1 + $0x60] sm:$0xff] }
   0x6   :  { %229 = vmatprep.subr.bf16.mxu0 %v228_v5  ;;  %257 = vmatprep.subr.bf16.mxu1 %v228_v5  ;;  %v244_v19 = vpack.c.bf16 %v41_v18, %v40_v17  ;;  %v43_v21 = vld [vmem:[%s367_s1 + $0x68] sm:$0xff]  ;;  %v44_v23 = vld [vmem:[%s367_s1 + $0x70] sm:$0xff]  ;;  %v45_v24 = vld [vmem:[%s367_s1 + $0x78] sm:$0xff] }
   0x7   :  { %218 = vmatprep.mubr.f32.mxu0 %v26_v9  ;;  %221 = vmatprep.mubr.f32.mxu1 %v28_v10  ;;  %v248_v22 = vpack.c.bf16 %v43_v21, %v42_v20  ;;  %v252_v25 = vpack.c.bf16 %v45_v24, %v44_v23  ;;  %v27_v26 = vld [vmem:[%s368_s0 + $0x8] sm:$0xff]  ;;  %v29_v27 = vld [vmem:[%s368_s0 + $0x18] sm:$0xff]  ;;  %v165_v28 = vld [vmem:[%s369_s2] ss:$0 sm:$0xff] }
   0x9   :  { %231 = vmatpush3.bf16.msra.mxu0 %v228_v5  ;;  %265 = vmatpush3.bf16.msra.mxu1 %v228_v5 }
   0xa   :  { %233 = vmatprep.subr.bf16.mxu0 %v232_v8  ;;  %258 = vmatprep.subr.bf16.mxu1 %v232_v8 }
   0xd   :  { %235 = vmatpush3.bf16.msra.mxu0 %v232_v8  ;;  %266 = vmatpush3.bf16.msra.mxu1 %v232_v8 }
   0xe   :  { %237 = vmatprep.subr.bf16.mxu0 %v236_v13  ;;  %259 = vmatprep.subr.bf16.mxu1 %v236_v13 }
  0x11   :  { %239 = vmatpush3.bf16.msra.mxu0 %v236_v13  ;;  %267 = vmatpush3.bf16.msra.mxu1 %v236_v13 }
  0x12   :  { %241 = vmatprep.subr.bf16.mxu0 %v240_v16  ;;  %260 = vmatprep.subr.bf16.mxu1 %v240_v16 }
  0x15   :  { %243 = vmatpush3.bf16.msra.mxu0 %v240_v16  ;;  %268 = vmatpush3.bf16.msra.mxu1 %v240_v16 }
  0x16   :  { %245 = vmatprep.subr.bf16.mxu0 %v244_v19  ;;  %261 = vmatprep.subr.bf16.mxu1 %v244_v19 }
  0x19   :  { %247 = vmatpush3.bf16.msra.mxu0 %v244_v19  ;;  %269 = vmatpush3.bf16.msra.mxu1 %v244_v19 }
  0x1a   :  { %249 = vmatprep.subr.bf16.mxu0 %v248_v22  ;;  %262 = vmatprep.subr.bf16.mxu1 %v248_v22 }
  0x1d   :  { %251 = vmatpush3.bf16.msra.mxu0 %v248_v22  ;;  %270 = vmatpush3.bf16.msra.mxu1 %v248_v22 }
  0x1e   :  { %253 = vmatprep.subr.bf16.mxu0 %v252_v25  ;;  %263 = vmatprep.subr.bf16.mxu1 %v252_v25 }
  0x21   :  { %255 = vmatpush3.bf16.msra.mxu0 %v252_v25  ;;  %271 = vmatpush3.bf16.msra.mxu1 %v252_v25 }
  0x24   :  { %219 = vmatmul.mubr.f32.vlgmr.msra.gmra.mrb[0].mxu0 %v27_v26  ;;  %222 = vmatmul.mubr.f32.vlgmr.msra.gmra.mrb[0].mxu1 %v29_v27 }
  0xf7   :  { %v220_v29 = vpop.f32.mrb[0].mxu0  ;;  %v223_v30 = vpop.f32.mrb[0].mxu1 }
  0xf8   :  { %v154_v31 = vadd.f32 %v220_v29, %v165_v28  ;;  %v156_v32 = vadd.f32 %v223_v30, %v165_v28  ;;  %v112_v33 = vpop.f32.mrb[1].mxu0  ;;  %v122_v34 = vpop.f32.mrb[1].mxu1 }
  0xf9   :  { %v153_v35 = vadd.f32 %v165_v28, %v112_v33  ;;  %v155_v36 = vadd.f32 %v165_v28, %v122_v34 }
  0xfa   :  { %158 = vst [vmem:[%s370_s3 + $0x8] sm:$0xff] %v154_v31  ;;  %160 = vst [vmem:[%s370_s3 + $0x18] sm:$0xff] %v156_v32 }
  0xfb   :  { %157 = vst [vmem:[%s370_s3] sm:$0xff] %v153_v35  ;;  %159 = vst [vmem:[%s370_s3 + $0x10] sm:$0xff] %v155_v36 }

</bundles_post_ra>
